<compile_context>
chip_gen: v5e
topology: v5e:2x2
jax: 0.10.0
libtpu: 0.0.40
codegen_flags: <defaults>
</compile_context>

<pallas_src>
import numpy as np
import jax
import jax.numpy as jnp
from jax.experimental import pallas as pl
from jax.experimental.pallas import tpu as pltpu


def _round_up(x, m):
    return ((x + m - 1) // m) * m


def _choose_row_tile(r8):
    """Pick a row tile (multiple of 8, <=256) that divides r8, preferring >=2 blocks."""
    for cand in (256, 128, 64, 32, 16, 8):
        if cand <= max(r8 // 2, 8) and r8 % cand == 0:
            return cand
    return r8


# ---------------------------------------------------------------------------
# Primary kernel: per row-tile,  out = gather_time(x) * f_keep * t_keep
#   x_ref  : (TR, T_pad) f32    flattened (B*F) rows, zero-padded time
#   idx_ref: (1,  T_pad) i32    nearest-neighbour source column per output column
#   fk_ref : (TR, 1)     f32    per-row (freq-mask) keep flag
#   tk_ref : (1,  T_pad) f32    per-column (time-mask + tail) keep flag
# ---------------------------------------------------------------------------
def _warp_mask_gather_kernel(x_ref, idx_ref, fk_ref, tk_ref, o_ref):
    x = x_ref[...]                                       # (TR, T_pad)
    idx = jnp.broadcast_to(idx_ref[...], x.shape)        # (TR, T_pad) int32
    warped = jnp.take_along_axis(x, idx, axis=1)         # nearest time warp (VPU/XLU)
    o_ref[...] = (warped * fk_ref[...] * tk_ref[...]).astype(o_ref.dtype)


def _warp_mask_gather(x_flat, idx, fk, tk, row_tile):
    r_pad, t_pad = x_flat.shape
    return pl.pallas_call(
        _warp_mask_gather_kernel,
        out_shape=jax.ShapeDtypeStruct((r_pad, t_pad), x_flat.dtype),
        grid=(r_pad // row_tile,),
        in_specs=[
            pl.BlockSpec((row_tile, t_pad), lambda i: (i, 0)),
            pl.BlockSpec((1, t_pad), lambda i: (0, 0)),
            pl.BlockSpec((row_tile, 1), lambda i: (i, 0)),
            pl.BlockSpec((1, t_pad), lambda i: (0, 0)),
        ],
        out_specs=pl.BlockSpec((row_tile, t_pad), lambda i: (i, 0)),
        compiler_params=pltpu.CompilerParams(
            dimension_semantics=("parallel",),
            vmem_limit_bytes=48 * 1024 * 1024,
        ),
    )(x_flat, idx, fk, tk)


# ---------------------------------------------------------------------------
# Fallback kernel (only if the lane gather does not lower on this Mosaic build):
# blocked one-hot matmul.  G is stored in bf16 (exact for a 0/1 matrix) to halve its
# HBM->VMEM traffic and cast to f32 in-kernel so x keeps full precision.
# ---------------------------------------------------------------------------
def _warp_mask_matmul_kernel(x_ref, g_ref, fk_ref, tk_ref, o_ref):
    g = g_ref[...].astype(jnp.float32)                   # one-hot, exact after cast
    warped = jnp.dot(x_ref[...], g, preferred_element_type=jnp.float32)
    o_ref[...] = (warped * fk_ref[...] * tk_ref[...]).astype(o_ref.dtype)


def _warp_mask_matmul(x_flat, g_bf16, fk, tk, row_tile, col_tile):
    r_pad, t_pad = x_flat.shape
    return pl.pallas_call(
        _warp_mask_matmul_kernel,
        out_shape=jax.ShapeDtypeStruct((r_pad, t_pad), x_flat.dtype),
        grid=(r_pad // row_tile, t_pad // col_tile),
        in_specs=[
            pl.BlockSpec((row_tile, t_pad), lambda i, j: (i, 0)),   # constant in j -> 1 fetch
            pl.BlockSpec((t_pad, col_tile), lambda i, j: (0, j)),
            pl.BlockSpec((row_tile, 1), lambda i, j: (i, 0)),
            pl.BlockSpec((1, col_tile), lambda i, j: (0, j)),
        ],
        out_specs=pl.BlockSpec((row_tile, col_tile), lambda i, j: (i, j)),
        compiler_params=pltpu.CompilerParams(
            dimension_semantics=("parallel", "parallel"),
            vmem_limit_bytes=48 * 1024 * 1024,
        ),
    )(x_flat, g_bf16, fk, tk)


# ---------------------------------------------------------------------------
# Host-side wrapper: reproduces the PyTorch module's control flow and numpy-based
# randomness, then dispatches the fused warp+mask Pallas kernel.
# ---------------------------------------------------------------------------
class SpecAugPallas:
    def __init__(self, prob_t_warp=0.5, t_factor=(0.9, 1.1),
                 f_mask_width=(0, 8), t_mask_width=(0, 10),
                 nb_f_masks=(1, 2), nb_t_masks=(1, 2), seed=0):
        self.prob_t_warp = prob_t_warp
        self.t_factor = t_factor
        self.f_mask_width = f_mask_width
        self.t_mask_width = t_mask_width
        self.nb_f_masks = nb_f_masks
        self.nb_t_masks = nb_t_masks
        self.rng = np.random.RandomState(seed)  # deterministic host randomness
        self._use_gather = None                 # decided once (Mosaic capability probe)

    def __call__(self, x):
        B, F, T_in = x.shape

        # Static, lane-dense padded time length (independent of the random warp factor).
        T_pad = _round_up(max(T_in, int(np.ceil(T_in * self.t_factor[1]))), 128)

        # --- time warp length + nearest-neighbour source indices (host RNG) ---
        if self.rng.uniform() < self.prob_t_warp:
            T_out = int(T_in * self.rng.uniform(*self.t_factor))
        else:
            T_out = T_in
        T_out = max(1, min(T_out, T_pad))
        # torch F.interpolate(mode='nearest'): src = floor(dst * T_in / T_out)
        src_idx = np.minimum(np.arange(T_out) * T_in // T_out, T_in - 1).astype(np.int32)

        # --- freq / time masks (zeroing bands), widths clamped for short clips ---
        f_keep = np.ones((F,), np.float32)
        for _ in range(self.rng.randint(*self.nb_f_masks)):
            f = int(self.rng.randint(*self.f_mask_width))
            f = min(f, max(F - 1, 0))
            f0 = int(self.rng.randint(0, max(F - f, 1)))
            f_keep[f0:f0 + f] = 0.0
        t_keep = np.ones((T_out,), np.float32)
        for _ in range(self.rng.randint(*self.nb_t_masks)):
            t = int(self.rng.randint(*self.t_mask_width))
            t = min(t, max(T_out - 1, 0))
            t0 = int(self.rng.randint(0, max(T_out - t, 1)))
            t_keep[t0:t0 + t] = 0.0

        # --- flatten batch into rows, pad to static tile-friendly shapes ---
        R = B * F
        R8 = _round_up(R, 8)
        row_tile = _choose_row_tile(R8)
        R_pad = _round_up(R8, row_tile)

        x_flat = jnp.pad(x.reshape(R, T_in), ((0, R_pad - R), (0, T_pad - T_in)))

        idx_full = np.zeros((1, T_pad), np.int32)
        idx_full[0, :T_out] = src_idx
        tk_full = np.zeros((1, T_pad), np.float32)   # tail columns masked to 0
        tk_full[0, :T_out] = t_keep
        fk_rows = np.zeros((R_pad, 1), np.float32)
        fk_rows[:R, 0] = np.tile(f_keep, B)

        idx_dev = jnp.asarray(idx_full)
        tk_dev = jnp.asarray(tk_full)
        fk_dev = jnp.asarray(fk_rows)

        out_flat = None
        if self._use_gather is None:
            try:
                out_flat = _warp_mask_gather(x_flat, idx_dev, fk_dev, tk_dev, row_tile)
                jax.block_until_ready(out_flat)
                self._use_gather = True
            except Exception:
                self._use_gather = False
                out_flat = None
        elif self._use_gather:
            out_flat = _warp_mask_gather(x_flat, idx_dev, fk_dev, tk_dev, row_tile)

        if out_flat is None:
            # Exact fallback: blocked bf16 one-hot matmul (only if gather doesn't lower).
            g = np.zeros((T_pad, T_pad), np.float32)
            g[idx_full[0], np.arange(T_pad)] = 1.0
            g[:, T_out:] = 0.0
            col_tile = 512 if T_pad % 512 == 0 else (256 if T_pad % 256 == 0 else 128)
            out_flat = _warp_mask_matmul(x_flat, jnp.asarray(g, jnp.bfloat16),
                                         fk_dev, tk_dev, row_tile, col_tile)

        out = out_flat[:R, :T_out].reshape(B, F, T_out)
        return out, (src_idx, f_keep, t_keep)


if __name__ == "__main__":
    # small shapes: batch=2, freq bins=16, time frames=64
    B, F, T = 2, 16, 64
    key = jax.random.PRNGKey(0)
    x = jax.random.normal(key, (B, F, T), dtype=jnp.float32)

    aug = SpecAugPallas(seed=0)
    out, (src_idx, f_keep, t_keep) = aug(x)
    out = jax.block_until_ready(out)

    # reference check in plain numpy (same host-sampled randomness)
    x_np = np.asarray(x)
    ref = x_np[:, :, src_idx]                 # nearest time warp
    ref = ref * f_keep[None, :, None]         # freq mask
    ref = ref * t_keep[None, None, :]         # time mask
    np.testing.assert_allclose(np.asarray(out), ref, rtol=1e-6, atol=1e-6)

    print("KERNEL_OK")
</pallas_src>

<mosaic_0001>
module attributes {stable_mosaic.version = 11 : i64} {
  func.func @_warp_mask_gather_kernel(%arg0: i32, %arg1: memref<16x128xf32, #tpu.memory_space<vmem>>, %arg2: memref<1x128xi32, #tpu.memory_space<vmem>>, %arg3: memref<16x1xf32, #tpu.memory_space<vmem>>, %arg4: memref<1x128xf32, #tpu.memory_space<vmem>>, %arg5: memref<16x128xf32, #tpu.memory_space<vmem>>) attributes {dimension_semantics = [#tpu.dimension_semantics<parallel>], iteration_bounds = array<i64: 2>, scalar_prefetch = 0 : i64, scratch_operands = 0 : i64, tpu.core_type = #tpu.core_type<tc>, window_params = [{transform_indices = @transform_0, window_bounds = array<i64: 16, 128>}, {pipeline_mode = #tpu.pipeline_mode<synchronous>, transform_indices = @transform_1, window_bounds = array<i64: 1, 128>}, {transform_indices = @transform_2, window_bounds = array<i64: 16, 1>}, {pipeline_mode = #tpu.pipeline_mode<synchronous>, transform_indices = @transform_3, window_bounds = array<i64: 1, 128>}, {transform_indices = @transform_4, window_bounds = array<i64: 16, 128>}]} {
    %c0 = arith.constant 0 : index
    %c0_0 = arith.constant 0 : index
    %0 = vector.load %arg1[%c0, %c0_0] : memref<16x128xf32, #tpu.memory_space<vmem>>, vector<16x128xf32>
    %c0_1 = arith.constant 0 : index
    %c0_2 = arith.constant 0 : index
    %1 = vector.load %arg2[%c0_1, %c0_2] : memref<1x128xi32, #tpu.memory_space<vmem>>, vector<1x128xi32>
    %2 = vector.shape_cast %1 : vector<1x128xi32> to vector<1x128xi32>
    %3 = vector.broadcast %2 : vector<1x128xi32> to vector<16x128xi32>
    %c0_i32 = arith.constant 0 : i32
    %4 = vector.broadcast %c0_i32 : i32 to vector<16x128xi32>
    %5 = arith.cmpi slt, %3, %4 : vector<16x128xi32>
    %c128_i32 = arith.constant 128 : i32
    %6 = vector.broadcast %c128_i32 : i32 to vector<16x128xi32>
    %7 = arith.addi %3, %6 : vector<16x128xi32>
    %8 = arith.select %5, %7, %3 : vector<16x128xi1>, vector<16x128xi32>
    %9 = vector.shape_cast %8 : vector<16x128xi32> to vector<16x128x1xi32>
    %10 = vector.shape_cast %9 : vector<16x128x1xi32> to vector<16x128xi32>
    %11 = tpu.dynamic_gather %0[%10] in [1] : vector<16x128xf32>, vector<16x128xi32> -> vector<16x128xf32>
    %c0_3 = arith.constant 0 : index
    %c0_4 = arith.constant 0 : index
    %12 = vector.load %arg3[%c0_3, %c0_4] : memref<16x1xf32, #tpu.memory_space<vmem>>, vector<16x1xf32>
    %13 = vector.broadcast %12 : vector<16x1xf32> to vector<16x128xf32>
    %14 = arith.mulf %11, %13 : vector<16x128xf32>
    %c0_5 = arith.constant 0 : index
    %c0_6 = arith.constant 0 : index
    %15 = vector.load %arg4[%c0_5, %c0_6] : memref<1x128xf32, #tpu.memory_space<vmem>>, vector<1x128xf32>
    %16 = vector.broadcast %15 : vector<1x128xf32> to vector<16x128xf32>
    %17 = arith.mulf %14, %16 : vector<16x128xf32>
    %c0_7 = arith.constant 0 : index
    %c0_8 = arith.constant 0 : index
    %18 = vector.load %arg5[%c0_7, %c0_8] : memref<16x128xf32, #tpu.memory_space<vmem>>, vector<16x128xf32>
    tpu.vector_store %arg5[%c0_7, %c0_8], %17 {strides = array<i32>} : memref<16x128xf32, #tpu.memory_space<vmem>>, vector<16x128xf32>,
    return
  }
  func.func @transform_0(%arg0: i32) -> (i32, i32) {
    %c0_i32 = arith.constant 0 : i32
    %c0_i32_0 = arith.constant 0 : i32
    return %arg0, %c0_i32 : i32, i32
  }
  func.func @transform_1(%arg0: i32) -> (i32, i32) {
    %c0_i32 = arith.constant 0 : i32
    %c0_i32_0 = arith.constant 0 : i32
    %c0_i32_1 = arith.constant 0 : i32
    return %c0_i32, %c0_i32_0 : i32, i32
  }
  func.func @transform_2(%arg0: i32) -> (i32, i32) {
    %c0_i32 = arith.constant 0 : i32
    %c0_i32_0 = arith.constant 0 : i32
    return %arg0, %c0_i32 : i32, i32
  }
  func.func @transform_3(%arg0: i32) -> (i32, i32) {
    %c0_i32 = arith.constant 0 : i32
    %c0_i32_0 = arith.constant 0 : i32
    %c0_i32_1 = arith.constant 0 : i32
    return %c0_i32, %c0_i32_0 : i32, i32
  }
  func.func @transform_4(%arg0: i32) -> (i32, i32) {
    %c0_i32 = arith.constant 0 : i32
    %c0_i32_0 = arith.constant 0 : i32
    return %arg0, %c0_i32 : i32, i32
  }
}

module attributes {stable_mosaic.version = 11 : i64} {
  func.func @_warp_mask_matmul_kernel(%arg0: i32, %arg1: i32, %arg2: memref<16x128xf32, #tpu.memory_space<vmem>>, %arg3: memref<128x128xbf16, #tpu.memory_space<vmem>>, %arg4: memref<16x1xf32, #tpu.memory_space<vmem>>, %arg5: memref<1x128xf32, #tpu.memory_space<vmem>>, %arg6: memref<16x128xf32, #tpu.memory_space<vmem>>) attributes {dimension_semantics = [#tpu.dimension_semantics<parallel>, #tpu.dimension_semantics<parallel>], iteration_bounds = array<i64: 2, 1>, scalar_prefetch = 0 : i64, scratch_operands = 0 : i64, tpu.core_type = #tpu.core_type<tc>, window_params = [{transform_indices = @transform_0, window_bounds = array<i64: 16, 128>}, {transform_indices = @transform_1, window_bounds = array<i64: 128, 128>}, {transform_indices = @transform_2, window_bounds = array<i64: 16, 1>}, {transform_indices = @transform_3, window_bounds = array<i64: 1, 128>}, {transform_indices = @transform_4, window_bounds = array<i64: 16, 128>}]} {
    %c0 = arith.constant 0 : index
    %c0_0 = arith.constant 0 : index
    %0 = vector.load %arg3[%c0, %c0_0] : memref<128x128xbf16, #tpu.memory_space<vmem>>, vector<128x128xbf16>
    %1 = arith.extf %0 : vector<128x128xbf16> to vector<128x128xf32>
    %c0_1 = arith.constant 0 : index
    %c0_2 = arith.constant 0 : index
    %2 = vector.load %arg2[%c0_1, %c0_2] : memref<16x128xf32, #tpu.memory_space<vmem>>, vector<16x128xf32>
    %cst = arith.constant dense<0.000000e+00> : vector<16x128xf32>
    %3 = tpu.matmul %2, %1, %cst {dimension_numbers = #tpu.dot_dimension_numbers<[1], [0], [0], [1], [0, 0, 1, 1], [], []>} : vector<16x128xf32>, vector<128x128xf32>, vector<16x128xf32> -> vector<16x128xf32>
    %c0_3 = arith.constant 0 : index
    %c0_4 = arith.constant 0 : index
    %4 = vector.load %arg4[%c0_3, %c0_4] : memref<16x1xf32, #tpu.memory_space<vmem>>, vector<16x1xf32>
    %5 = vector.broadcast %4 : vector<16x1xf32> to vector<16x128xf32>
    %6 = arith.mulf %3, %5 : vector<16x128xf32>
    %c0_5 = arith.constant 0 : index
    %c0_6 = arith.constant 0 : index
    %7 = vector.load %arg5[%c0_5, %c0_6] : memref<1x128xf32, #tpu.memory_space<vmem>>, vector<1x128xf32>
    %8 = vector.broadcast %7 : vector<1x128xf32> to vector<16x128xf32>
    %9 = arith.mulf %6, %8 : vector<16x128xf32>
    %c0_7 = arith.constant 0 : index
    %c0_8 = arith.constant 0 : index
    %10 = vector.load %arg6[%c0_7, %c0_8] : memref<16x128xf32, #tpu.memory_space<vmem>>, vector<16x128xf32>
    tpu.vector_store %arg6[%c0_7, %c0_8], %9 {strides = array<i32>} : memref<16x128xf32, #tpu.memory_space<vmem>>, vector<16x128xf32>,
    return
  }
  func.func @transform_0(%arg0: i32, %arg1: i32) -> (i32, i32) {
    %c0_i32 = arith.constant 0 : i32
    %c0_i32_0 = arith.constant 0 : i32
    return %arg0, %c0_i32 : i32, i32
  }
  func.func @transform_1(%arg0: i32, %arg1: i32) -> (i32, i32) {
    %c0_i32 = arith.constant 0 : i32
    %c0_i32_0 = arith.constant 0 : i32
    return %c0_i32, %arg1 : i32, i32
  }
  func.func @transform_2(%arg0: i32, %arg1: i32) -> (i32, i32) {
    %c0_i32 = arith.constant 0 : i32
    %c0_i32_0 = arith.constant 0 : i32
    return %arg0, %c0_i32 : i32, i32
  }
  func.func @transform_3(%arg0: i32, %arg1: i32) -> (i32, i32) {
    %c0_i32 = arith.constant 0 : i32
    %c0_i32_0 = arith.constant 0 : i32
    return %c0_i32, %arg1 : i32, i32
  }
  func.func @transform_4(%arg0: i32, %arg1: i32) -> (i32, i32) {
    %c0_i32 = arith.constant 0 : i32
    return %arg0, %arg1 : i32, i32
  }
}

</mosaic_0001>

<bundles_post_ra>
// kernel: tpu_custom_call.1
= control target key start
LH: loop header
LB: loop body
LE: loop exit
PB: predicated region body
PF: predicated region fallthrough
CT: control target
= control target key end

     0   :  { %9 = vsyncpa [#allocation3], 0  ;;  %s593_s0 = inlined_call_operand.vmem [shape: f32[32,128], index: 0, kind: input, shape index: {}]   ;;  %s594_s1 = inlined_call_operand.vmem [shape: s32[1,128], index: 1, kind: input, shape index: {}]   ;;  %s595_s2 = inlined_call_operand.vmem [shape: f32[32,1], index: 2, kind: input, shape index: {}]   ;;  %s596_s3 = inlined_call_operand.vmem [shape: f32[1,128], index: 3, kind: input, shape index: {}]   ;;  %s597_s4 = inlined_call_operand.hbm [shape: f32[32,128], index: 4, kind: output, shape index: {}]  }
   0x1   :  { %11 = vsyncpa [#allocation3 + $0x1], 0  ;;  %s500_s15 = smov 0   ;;  %s502_s16 = smov 0  }
   0x2   :  { %s504_s17 = smov 0   ;;  %s506_s18 = smov 0  }
   0x3 LB: > { %s521_s19 = sadd.s32 4294967295, %s470_s18   ;;  %s346_s20 = sadd.s32 4294967294, %s470_s18   ;;  %s470_s18 = sphi %s506_s18, %s603_s18   ;;  %s466_s17 = sphi %s504_s17, %s602_s17   ;;  %s462_s16 = sphi %s502_s16, %s601_s16   ;;  %s458_s15 = sphi %s500_s15, %s600_s15  }
   0x4   : > { %s525_s21 = sadd.s32 1, %s470_s18   ;;  %s118_s22 = sadd.s32 1, %s466_s17 }
   0x5   : > { %s115_s23 = ssub.s32 %s470_s18, %s525_s21  ;;  %p128_p0 = scmp.ne.s32.totalorder %s466_s17, %s462_s16 }
   0x6   : > { %p116_p1 = scmp.eq.s32.totalorder %s115_s23, 0  ;;  %p129_p2 = scmp.eq.s32.totalorder %s521_s19, 1 }
   0x7   : > { %p134_p3 = scmp.ne.s32.totalorder %s462_s16, %s458_s15  ;;  %p135_p4 = scmp.eq.s32.totalorder %s346_s20, 1 }
   0x8   : > { %s536_s24 = scalar_select %p116_p1, %s466_s17, %s118_s22  }
   0x9   : > { %p538_p5 = por %p129_p2, %p128_p0  ;;  %p542_p6 = por %p135_p4, %p134_p3 }
   0xa   : > { %p349_p7 = scmp.ge.s32.totalorder %s470_s18, 1  ;;  %p177_p8 = scmp.lt.s32.totalorder %s470_s18, 3 }
   0xc   : > { %p178_p9 = pnand %p349_p7, %p177_p8 }
   0xd   : > { %s351_s29 = sshll.u32 (!%p178_p9), %s521_s19, 1  ;;  %s205_s11 = sand.u32 (!%p178_p9), 1, %s462_s16  }
   0xe   : > { %181 = sbr.rel (%p178_p9) target bundleno = 162 (0xa2), region = 36  ;;  %p209_p10 = scmp.lt.s32.totalorder (!%p178_p9), %s351_s29, 3 }
   0xf   : > { %s350_s14 = sshll.u32 (!%p178_p9), %s205_s11, 4  ;;  %s360_s20 = sshll.u32 (!%p178_p9), %s521_s19, 4 }
  0x10   : > { %s268_s27 = scalar_lea.hbm (!%p178_p9), %s597_s4, %s360_s20  ;;  %s207_s28 = scalar_lea.vmem (!%p178_p9), [#allocation2], %s350_s14 }
  0x11   : > { %s257_s5 = scalar_lea.sflag (!%p178_p9), [#allocation3], %s205_s11  ;;  %s428_s9 = scalar_lea.hbm (!%p178_p9), %s597_s4, 32 }
  0x13   : > { %v406_v0 = vld [vmem:[%s594_s1] ss:$0 sm:$0xff]  ;;  %v472_v1 = vmov 0   ;;  %s605_s29 = smov (!%p209_p10, %s351_s29), 3 }
  0x14   : > { %404 = vset.pattern.permute.xlu1 %v472_v1  ;;  %vm225_vm0 = vcmp.lt.s32.totalorder %v406_v0, 0  ;;  %v226_v2 = vadd.s32 128, %v406_v0  ;;  %s352_s30 = sshll.u32 %s605_s29, 3  ;;  %v407_v9 = vld [vmem:[%s596_s3] ss:$0 sm:$0xff]  ;;  %s269_s29 = sshll.u32 %s207_s28, 4  ;;  %s270_s29 = int_to_ptr.vmem [resolvable:$true] %s269_s29 }
  0x15   : > { %s218_s7 = scalar_lea.vmem %s595_s2, %s352_s30  ;;  %s212_s10 = scalar_lea.vmem %s593_s0, %s352_s30 }
  0x16   : > { %v227_v3 = vsel %vm225_vm0, %v226_v2, %v406_v0  ;;  %v234_v4 = vld [vmem:[%s218_s7] sm:$0xff]  ;;  %v235_v6 = vld [vmem:[%s218_s7 + $0x8] sm:$0xff]  ;;  %s271_s30 = sshll.u32 %s268_s27, 4  ;;  %s272_s30 = int_to_ptr.hbm [resolvable:$true] %s271_s30 }
  0x17   : > { %403 = vset.pattern.permute.xlu0 %v227_v3  ;;  %238 = vperm.xlu1 %404, %v234_v4   ;;  %v221_v5 = vld [vmem:[%s212_s10] sm:$0xff]  ;;  %v222_v7 = vld [vmem:[%s212_s10 + $0x8] sm:$0xff]  ;;  %s422_s6 = sshra.s32 %s272_s30, 4  ;;  %s423_s6 = int_to_ptr.hbm [resolvable:$true] %s422_s6 }
  0x18   : > { %s424_s19 = scalar_lea.hbm %s423_s6, 16  ;;  %p429_p0 = scmp.lt.s32.totalorder %s423_s6, %s597_s4 }
  0x19   : > { %p425_p11 = scmp.ne.s32.totalorder %s423_s6, %s424_s19  ;;  %p430_p1 = scmp.lt.s32.totalorder %s428_s9, %s424_s19 }
  0x1b   : > { %p426_p12 = pnand %p425_p11, %p538_p5  ;;  %p431_p2 = por %p430_p1, %p429_p0 }
  0x1d   : > { %p427_p13 = pneg %p426_p12 }
  0x1f   : > { %229 = vperm.xlu0 %403, %v221_v5   ;;  %243 = vperm.xlu1 %404, %v235_v6   ;;  %p432_p3 = pnand %p431_p2, %p427_p13 }
  0x27   : > { %232 = vperm.xlu0 %403, %v222_v7  }
  0x2f   : > { %405 = vset.pattern.permute.xlu0 %v472_v1 }
  0x89   : > { %v239_v8 = vpop.permute.xlu1 %238 }
  0x91   : > { %v230_v10 = vpop.permute.xlu0 %229  ;;  %v244_v13 = vpop.permute.xlu1 %243 }
  0x92   : > { %v246_v11 = vmul.f32 %v239_v8, %v230_v10 }
  0x94   : > { %v252_v12 = vmul.f32 %v407_v9, %v246_v11 }
  0x96   : > { %254 = vst [vmem:[%s207_s28] sm:$0xff] %v252_v12 }
  0x99   : > { %v233_v14 = vpop.permute.xlu0 %232 }
  0x9a   : > { %v247_v15 = vmul.f32 %v244_v13, %v233_v14 }
  0x9c   : > { %v253_v16 = vmul.f32 %v407_v9, %v247_v15 }
  0x9e   : > { %255 = vst [vmem:[%s207_s28 + $0x8] sm:$0xff] %v253_v16 }
  0x9f   : > { %435 = shalt.err (!%p432_p3)
}
  0xa0   : > { %s473_s11 = smov 128   ;;  %s474_s13 = smov 8  }
  0xa1   : > { %361 = dma.vmem_to_hbm [thread:$0]  (%p538_p5), %s270_s29, 256, %s272_s30, %s257_s5, %s473_s11, %s473_s11, %s474_s13  }
  0xa2 PF: > { %p367_p4 = scmp.ge.s32.totalorder %s470_s18, 2  ;;  %s286_s14 = sand.u32 1, %s458_s15  }
  0xa3   : > { %s287_s20 = scalar_lea.sflag [#allocation3], %s286_s14 }
  0xa4   : > { %p364_p7 = pnand %p367_p4, %p542_p6 }
  0xa6   : > { %p365_p8 = pneg %p364_p7 }
  0xa8   : > { %453 = dma.done.wait (%p365_p8), %s287_s20, 256  }
  0xa9   : > { %455 = vsyncadd (%p365_p8), %s287_s20, 4294967040  ;;  %p14_p9 = scmp.ge.s32.totalorder %s525_s21, 4   ;;  %s600_s15 = smov %s462_s16 }
  0xaa   : > { %s601_s16 = smov %s466_s17  ;;  %s602_s17 = smov %s536_s24 }
  0xab   : > { %s603_s18 = smov %s525_s21  ;;  %16 = sbr.rel (!%p14_p9) target bundleno = 3 (0x3), region = 74 }
  0xb0   :  { %293 = vsyncpa [#allocation3], 1 }
  0xb1   :  { %295 = vsyncpa [#allocation3 + $0x1], 1 }

// kernel: tpu_custom_call.1
= control target key start
LH: loop header
LB: loop body
LE: loop exit
PB: predicated region body
PF: predicated region fallthrough
CT: control target
= control target key end

     0   :  { %9 = vsyncpa [#allocation3], 0  ;;  %s883_s0 = inlined_call_operand.vmem [shape: f32[32,128], index: 0, kind: input, shape index: {}]   ;;  %s884_s1 = inlined_call_operand.hbm [shape: bf16[128,128], index: 1, kind: input, shape index: {}]   ;;  %s885_s2 = inlined_call_operand.vmem [shape: f32[32,1], index: 2, kind: input, shape index: {}]   ;;  %s886_s3 = inlined_call_operand.vmem [shape: f32[1,128], index: 3, kind: input, shape index: {}]   ;;  %s887_s4 = inlined_call_operand.hbm [shape: f32[32,128], index: 4, kind: output, shape index: {}]  }
   0x1   :  { %10 = vsyncpa [#allocation4], 0 }
   0x2   :  { %12 = vsyncpa [#allocation4 + $0x1], 0  ;;  %s771_s15 = smov 0   ;;  %s773_s16 = smov 0  }
   0x3   :  { %s775_s17 = smov 0   ;;  %s777_s18 = smov 0  }
   0x4   :  { %s779_s19 = smov 0   ;;  %s781_s20 = smov 0  }
   0x5 LB: > { %s479_s21 = sadd.s32 4294967295, %s738_s20   ;;  %s480_s22 = sadd.s32 4294967294, %s738_s20   ;;  %s738_s20 = sphi %s781_s20, %s18_s20   ;;  %s734_s19 = sphi %s779_s19, %s894_s19   ;;  %s730_s18 = sphi %s777_s18, %s893_s18   ;;  %s726_s17 = sphi %s775_s17, %s892_s17   ;;  %s722_s16 = sphi %s773_s16, %s891_s16   ;;  %s718_s15 = sphi %s771_s15, %s890_s15  }
   0x6   : > { %s30_s23 = sadd.s32 1, %s734_s19  ;;  %s143_s24 = sadd.s32 1, %s726_s17 }
   0x7   : > { %p32_p0 = scmp.ge.s32.totalorder %s30_s23, 2  ;;  %p153_p1 = scmp.ne.s32.totalorder %s726_s17, %s722_s16 }
   0x8   : > { %p154_p2 = scmp.eq.s32.totalorder %s479_s21, 1  ;;  %p159_p3 = scmp.ne.s32.totalorder %s722_s16, %s718_s15 }
   0x9   : > { %s896_s23 = smov (%p32_p0, %s30_s23), 0  ;;  %p160_p5 = scmp.eq.s32.totalorder %s480_s22, 1 }
   0xa   : > { %p811_p4 = por %p154_p2, %p153_p1  ;;  %s138_s26 = ssub.s32 %s734_s19, %s896_s23 }
   0xb   : > { %p481_p6 = scmp.ge.s32.totalorder %s738_s20, 1  ;;  %p141_p7 = scmp.eq.s32.totalorder %s138_s26, 0 }
   0xc   : > { %p818_p8 = por %p160_p5, %p159_p3  ;;  %p167_p9 = scmp.lt.s32.totalorder %s738_s20, 3 }
   0xd   : > { %s824_s28 = scalar_select %p141_p7, %s726_s17, %s143_s24  }
   0xe   : > { %p168_p10 = pnand %p481_p6, %p167_p9  ;;  %p567_p11 = scmp.eq.s32.totalorder %s479_s21, 0 }
   0xf   : > { %s180_s5 = sshll.u32 %s884_s1, 4  ;;  %s740_s6 = smov [#allocation2]   ;;  %s181_s5 = int_to_ptr.hbm [resolvable:$true] %s180_s5 }
  0x10   : > { %p559_p12 = pneg %p168_p10  ;;  %s182_s7 = sshll.u32 %s740_s6, 4  ;;  %s183_s7 = int_to_ptr.vmem [resolvable:$true] %s182_s7 }
  0x11   : > { %s741_s8 = smov 64   ;;  %s742_s9 = smov 4  }
  0x12   : > { %p560_p13 = pnand %p567_p11, %p559_p12  ;;  %222 = sbr.rel (%p168_p10) target bundleno = 193 (0xc1), region = 36 }
  0x14   : > { %562 = dma.hbm_to_vmem [thread:$0]  (!%p560_p13), %s181_s5, 1024, %s183_s7, [#allocation3], %s741_s8, %s741_s8, %s742_s9  }
  0x17   : > { %709 = dma.done.wait (%p567_p11), [#allocation3], 1024  }
  0x18   : > { %711 = vsyncadd (%p567_p11), [#allocation3], 4294966272  ;;  %s488_s10 = sshll.u32 %s730_s18, 1  ;;  %v743_v0 = vmov 0   ;;  %v536_v1 = vld [vmem:[#allocation2 + $0x38] sm:$0xff]   ;;  %v535_v2 = vld [vmem:[#allocation2 + $0x30] sm:$0xff]  }
  0x19   : > { %p258_p0 = scmp.lt.s32.totalorder %s488_s10, 3  ;;  %624 = vset.pattern.permute.xlu0 %v743_v0  ;;  %v529_v3 = vunpack.c.h.bf16 %v536_v1  ;;  %v528_v4 = vunpack.c.l.bf16 %v536_v1  ;;  %v525_v6 = vunpack.c.h.bf16 %v535_v2  ;;  %v534_v7 = vld [vmem:[#allocation2 + $0x28] sm:$0xff]   ;;  %v524_v8 = vunpack.c.l.bf16 %v535_v2  ;;  %v533_v10 = vld [vmem:[#allocation2 + $0x20] sm:$0xff]   ;;  %v532_v14 = vld [vmem:[#allocation2 + $0x18] sm:$0xff]   ;;  %s254_s26 = sand.u32 1, %s722_s16  }
  0x1a   : > { %v521_v9 = vunpack.c.h.bf16 %v534_v7  ;;  %v520_v11 = vunpack.c.l.bf16 %v534_v7  ;;  %v517_v13 = vunpack.c.h.bf16 %v533_v10  ;;  %v516_v15 = vunpack.c.l.bf16 %v533_v10  ;;  %v531_v17 = vld [vmem:[#allocation2 + $0x10] sm:$0xff]   ;;  %v530_v20 = vld [vmem:[#allocation2 + $0x8] sm:$0xff]   ;;  %v499_v23 = vld [vmem:[#allocation2] sm:$0xff]   ;;  %s487_s29 = sshll.u32 %s254_s26, 4  ;;  %s497_s30 = sshll.u32 %s730_s18, 4 }
  0x1b   : > { %s898_s10 = smov (!%p258_p0, %s488_s10), 3  ;;  %307 = vmatpush.msra.mxu0 %v529_v3  ;;  %537 = vmatpush.msra.mxu1 %v529_v3  ;;  %v513_v16 = vunpack.c.h.bf16 %v532_v14  ;;  %v512_v18 = vunpack.c.l.bf16 %v532_v14  ;;  %v509_v19 = vunpack.c.h.bf16 %v531_v17  ;;  %v508_v21 = vunpack.c.l.bf16 %v531_v17  ;;  %s365_s7 = scalar_lea.hbm %s887_s4, %s497_s30  ;;  %v625_v31 = vld [vmem:[%s886_s3] ss:$0 sm:$0xff] }
  0x1c   : > { %s489_s11 = sshll.u32 %s898_s10, 3  ;;  %v505_v22 = vunpack.c.h.bf16 %v530_v20  ;;  %v504_v24 = vunpack.c.l.bf16 %v530_v20  ;;  %v501_v25 = vunpack.c.h.bf16 %v499_v23  ;;  %v500_v26 = vunpack.c.l.bf16 %v499_v23  ;;  %s256_s10 = scalar_lea.vmem [#allocation5], %s487_s29 }
  0x1d   : > { %s267_s14 = scalar_lea.vmem %s885_s2, %s489_s11  ;;  %308 = vmatpush.msra.mxu0 %v528_v4  ;;  %538 = vmatpush.msra.mxu1 %v528_v4  ;;  %s261_s24 = scalar_lea.vmem %s883_s0, %s489_s11 }
  0x1e   : > { %v330_v5 = vld [vmem:[%s267_s14] sm:$0xff]  ;;  %v331_v12 = vld [vmem:[%s267_s14 + $0x8] sm:$0xff]  ;;  %s366_s11 = sshll.u32 %s256_s10, 4  ;;  %s368_s12 = sshll.u32 %s365_s7, 4  ;;  %s367_s11 = int_to_ptr.vmem [resolvable:$true] %s366_s11  ;;  %s369_s12 = int_to_ptr.hbm [resolvable:$true] %s368_s12 }
  0x1f   : > { %334 = vperm.xlu0 %624, %v330_v5   ;;  %309 = vmatpush.msra.mxu0 %v525_v6  ;;  %v305_v27 = vld [vmem:[%s261_s24] sm:$0xff]  ;;  %v306_v28 = vld [vmem:[%s261_s24 + $0x8] sm:$0xff]  ;;  %s353_s18 = scalar_lea.sflag [#allocation4], %s254_s26  ;;  %s670_s13 = sshra.s32 %s369_s12, 4  ;;  %s671_s13 = int_to_ptr.hbm [resolvable:$true] %s670_s13 }
  0x20   : > { %539 = vmatpush.msra.mxu1 %v525_v6  ;;  %s672_s14 = scalar_lea.hbm %s671_s13, 16  ;;  %s676_s24 = scalar_lea.hbm %s887_s4, 32 }
  0x21   : > { %310 = vmatpush.msra.mxu0 %v524_v8  ;;  %p673_p1 = scmp.ne.s32.totalorder %s671_s13, %s672_s14  ;;  %p677_p5 = scmp.lt.s32.totalorder %s671_s13, %s887_s4 }
  0x22   : > { %540 = vmatpush.msra.mxu1 %v524_v8  ;;  %p678_p6 = scmp.lt.s32.totalorder %s676_s24, %s672_s14 }
  0x23   : > { %311 = vmatpush.msra.mxu0 %v521_v9  ;;  %p674_p2 = pnand %p673_p1, %p811_p4 }
  0x24   : > { %541 = vmatpush.msra.mxu1 %v521_v9  ;;  %p679_p7 = por %p678_p6, %p677_p5 }
  0x25   : > { %312 = vmatpush.msra.mxu0 %v520_v11  ;;  %p675_p3 = pneg %p674_p2 }
  0x26   : > { %542 = vmatpush.msra.mxu1 %v520_v11 }
  0x27   : > { %339 = vperm.xlu0 %624, %v331_v12   ;;  %313 = vmatpush.msra.mxu0 %v517_v13  ;;  %p680_p9 = pnand %p679_p7, %p675_p3 }
  0x28   : > { %543 = vmatpush.msra.mxu1 %v517_v13 }
  0x29   : > { %314 = vmatpush.msra.mxu0 %v516_v15 }
  0x2a   : > { %544 = vmatpush.msra.mxu1 %v516_v15 }
  0x2b   : > { %315 = vmatpush.msra.mxu0 %v513_v16 }
  0x2c   : > { %545 = vmatpush.msra.mxu1 %v513_v16 }
  0x2d   : > { %316 = vmatpush.msra.mxu0 %v512_v18 }
  0x2e   : > { %546 = vmatpush.msra.mxu1 %v512_v18 }
  0x2f   : > { %317 = vmatpush.msra.mxu0 %v509_v19 }
  0x30   : > { %547 = vmatpush.msra.mxu1 %v509_v19 }
  0x31   : > { %318 = vmatpush.msra.mxu0 %v508_v21 }
  0x32   : > { %548 = vmatpush.msra.mxu1 %v508_v21 }
  0x33   : > { %319 = vmatpush.msra.mxu0 %v505_v22 }
  0x34   : > { %549 = vmatpush.msra.mxu1 %v505_v22 }
  0x35   : > { %320 = vmatpush.msra.mxu0 %v504_v24 }
  0x36   : > { %550 = vmatpush.msra.mxu1 %v504_v24 }
  0x37   : > { %321 = vmatpush.msra.mxu0 %v501_v25 }
  0x38   : > { %551 = vmatpush.msra.mxu1 %v501_v25 }
  0x39   : > { %322 = vmatpush.msra.mxu0 %v500_v26 }
  0x3a   : > { %552 = vmatpush.msra.mxu1 %v500_v26  ;;  %323 = vmatmul.f32.vlgmr.msra.gmra.mxu0 %v305_v27 }
  0x3b   : > { %326 = vmatmul.f32.vlgmr.msra.gmra.mxu1 %v306_v28 }
  0x91   : > { %v335_v29 = vpop.permute.xlu0 %334 }
  0x99   : > { %v340_v30 = vpop.permute.xlu0 %339 }
  0xb7   : > { %v324_v32 = vpop.f32.mrf.mxu0 }
  0xb8   : > { %v327_v33 = vpop.f32.mrf.mxu1  ;;  %v342_v34 = vmul.f32 %v335_v29, %v324_v32 }
  0xb9   : > { %v343_v35 = vmul.f32 %v340_v30, %v327_v33 }
  0xba   : > { %v348_v36 = vmul.f32 %v625_v31, %v342_v34 }
  0xbb   : > { %v349_v37 = vmul.f32 %v625_v31, %v343_v35 }
  0xbc   : > { %350 = vst [vmem:[%s256_s10] sm:$0xff] %v348_v36 }
  0xbd   : > { %351 = vst [vmem:[%s256_s10 + $0x8] sm:$0xff] %v349_v37 }
  0xbe   : > { %683 = shalt.err (!%p680_p9)
}
  0xbf   : > { %s744_s26 = smov 128   ;;  %s745_s5 = smov 8  }
  0xc0   : > { %557 = dma.vmem_to_hbm [thread:$0]  (%p811_p4), %s367_s11, 256, %s369_s12, %s353_s18, %s744_s26, %s744_s26, %s745_s5  }
  0xc1 PF: > { %p569_p10 = scmp.ge.s32.totalorder %s738_s20, 2  ;;  %s383_s6 = sand.u32 1, %s718_s15  }
  0xc2   : > { %s384_s7 = scalar_lea.sflag [#allocation4], %s383_s6 }
  0xc3   : > { %p564_p11 = pnand %p569_p10, %p818_p8 }
  0xc5   : > { %p565_p12 = pneg %p564_p11 }
  0xc7   : > { %713 = dma.done.wait (%p565_p12), %s384_s7, 256  }
  0xc8   : > { %715 = vsyncadd (%p565_p12), %s384_s7, 4294967040  ;;  %s18_s20 = sadd.s32 1, %s738_s20   ;;  %s890_s15 = smov %s722_s16 }
  0xc9   : > { %p15_p13 = scmp.ge.s32.totalorder %s18_s20, 4   ;;  %s891_s16 = smov %s726_s17 }
  0xca   : > { %s892_s17 = smov %s824_s28  ;;  %s893_s18 = smov %s734_s19 }
  0xcb   : > { %s894_s19 = smov %s896_s23  ;;  %17 = sbr.rel (!%p15_p13) target bundleno = 5 (0x5), region = 83 }
  0xd0   :  { %390 = vsyncpa [#allocation3], 1 }
  0xd1   :  { %392 = vsyncpa [#allocation3 + $0x1], 1 }
  0xd2   :  { %393 = vsyncpa [#allocation4], 1 }
  0xd3   :  { %395 = vsyncpa [#allocation4 + $0x1], 1 }

</bundles_post_ra>
